<compile_context>
chip_gen: v7x
topology: tpu7x:2x2x1
jax: 0.10.0
libtpu: 0.0.40
codegen_flags: <defaults>
</compile_context>

<pallas_src>
import math

import jax
import jax.numpy as jnp
from jax.experimental import pallas as pl
from jax.experimental.pallas import tpu as pltpu


def _resample_matmul_kernel(lhs_ref, w_ref, out_ref):
    # lhs_ref: (P*B, win_len) f32  -- P periods x B batch rows of the waveform
    # w_ref:   (win_len, out_per) f32 -- fused periodic lerp weights (resident)
    # out_ref: (P*B, out_per) f32
    out_ref[...] = jnp.dot(lhs_ref[...], w_ref[...],
                           preferred_element_type=jnp.float32)


def _build_period_weights(in_per, out_per, win_len):
    """Fused gather+lerp weights for one output period (exact integer math)."""
    m = jnp.arange(out_per, dtype=jnp.int32)
    d = (m * in_per) // out_per                                   # floor index
    frac = ((m * in_per) % out_per).astype(jnp.float32) / float(out_per)
    rows = jnp.arange(win_len, dtype=jnp.int32)[:, None]          # (win_len, 1)
    w = (jnp.where(rows == d[None, :], 1.0 - frac[None, :], 0.0)
         + jnp.where(rows == (d + 1)[None, :], frac[None, :], 0.0))
    return w.astype(jnp.float32)


def change_sample_rate(wav, input_rate: int, output_rate: int,
                       periods_per_tile=None):
    """JAX/Pallas equivalent of ChangeSampleRate.forward.

    wav: any shape (B, ...); flattened to (B, T) like torch .view(B, -1).
    Returns (B, L) with L = T * output_rate // input_rate.
    """
    B = wav.shape[0]
    wav2d = wav.reshape(B, -1).astype(jnp.float32)
    T = wav2d.shape[1]
    L = T * output_rate // input_rate

    g = math.gcd(input_rate, output_rate)
    in_per = input_rate // g
    out_per = output_rate // g

    # Input samples touched by one period of outputs: 0 .. ((out_per-1)*in_per)//out_per + 1.
    span = ((out_per - 1) * in_per) // out_per + 2
    # When downsampling span == in_per, so per-period windows are exactly the
    # contiguous non-overlapping in_per chunks (pure reshape, no gather).
    win_len = max(in_per, span)

    n_periods = max(1, -(-L // out_per))                         # ceil(L / out_per)
    if periods_per_tile is None:
        periods_per_tile = max(1, 256 // max(B, 1))              # target M ~ 256 (one MXU pass)
    P = max(1, min(periods_per_tile, n_periods))
    n_tiles = -(-n_periods // P)
    total_periods = n_tiles * P

    # Edge-pad so every window is in-bounds; edge mode also reproduces the
    # torch clamp(max=T-1) on round_up for the last valid sample.
    needed = (total_periods - 1) * in_per + win_len
    pad = max(0, needed - T)
    wav_pad = jnp.pad(wav2d, ((0, 0), (0, pad)), mode="edge")

    if win_len == in_per:
        lhs = wav_pad[:, :total_periods * in_per].reshape(B, n_tiles, P, win_len)
    else:
        # Overlapping windows (only hit when upsampling): gather in the wrapper.
        idx = (jnp.arange(total_periods) * in_per)[:, None] + jnp.arange(win_len)[None, :]
        lhs = jnp.take(wav_pad, idx, axis=1).reshape(B, n_tiles, P, win_len)
    # Layout plumbing: (B, n_tiles, P, win) -> (n_tiles, P*B, win) so each
    # grid tile is a lane-major matmul LHS with M = P*B rows.
    lhs = jnp.transpose(lhs, (1, 2, 0, 3)).reshape(n_tiles, P * B, win_len)

    w = _build_period_weights(in_per, out_per, win_len)

    out = pl.pallas_call(
        _resample_matmul_kernel,
        out_shape=jax.ShapeDtypeStruct((n_tiles, P * B, out_per), jnp.float32),
        grid=(n_tiles,),
        in_specs=[
            pl.BlockSpec((None, P * B, win_len), lambda j: (j, 0, 0)),
            pl.BlockSpec((win_len, out_per), lambda j: (0, 0)),   # resident weights
        ],
        out_specs=pl.BlockSpec((None, P * B, out_per), lambda j: (j, 0, 0)),
        compiler_params=pltpu.CompilerParams(
            dimension_semantics=("parallel",)),
    )(lhs, w)

    # Un-im2col the output and drop the period padding.
    out = out.reshape(n_tiles, P, B, out_per)
    out = jnp.transpose(out, (2, 0, 1, 3)).reshape(B, total_periods * out_per)
    return out[:, :L]


def _reference(wav, input_rate, output_rate):
    """Pure-JAX reference (exact rational index/frac, same semantics as kernel)."""
    B = wav.shape[0]
    wav2d = wav.reshape(B, -1).astype(jnp.float32)
    T = wav2d.shape[1]
    L = T * output_rate // input_rate
    g = math.gcd(input_rate, output_rate)
    in_per, out_per = input_rate // g, output_rate // g
    n = jnp.arange(L, dtype=jnp.int32)
    idx_dn = (n * in_per) // out_per
    idx_up = jnp.minimum(idx_dn + 1, T - 1)
    frac = ((n * in_per) % out_per).astype(jnp.float32) / float(out_per)
    down = wav2d[:, idx_dn]
    up = wav2d[:, idx_up]
    return down * (1.0 - frac)[None, :] + up * frac[None, :]


if __name__ == "__main__":
    # ChangeSampleRate(input_rate=22050, output_rate=16000).
    input_rate, output_rate = 22050, 16000
    k0, k1 = jax.random.split(jax.random.PRNGKey(0), 2)

    # Small case: (batch=2, channels=1, samples=256); forward flattens to (2, 256).
    wav_small = jax.random.normal(k0, (2, 1, 256), dtype=jnp.float32)
    out_small = jax.block_until_ready(
        change_sample_rate(wav_small, input_rate, output_rate))
    ref_small = _reference(wav_small, input_rate, output_rate)
    assert out_small.shape == ref_small.shape, (out_small.shape, ref_small.shape)
    assert jnp.allclose(out_small, ref_small, atol=1e-5, rtol=1e-5)

    # Larger case exercising multiple grid tiles + period padding.
    wav_big = jax.random.normal(k1, (2, 1, 4096), dtype=jnp.float32)
    out_big = jax.block_until_ready(
        change_sample_rate(wav_big, input_rate, output_rate, periods_per_tile=4))
    ref_big = _reference(wav_big, input_rate, output_rate)
    assert out_big.shape == ref_big.shape, (out_big.shape, ref_big.shape)
    assert jnp.allclose(out_big, ref_big, atol=1e-5, rtol=1e-5)

    print("KERNEL_OK")
</pallas_src>

<mosaic_0001>
module attributes {stable_mosaic.version = 11 : i64} {
  func.func @_resample_matmul_kernel(%arg0: i32, %arg1: memref<1x2x441xf32, #tpu.memory_space<vmem>>, %arg2: memref<441x320xf32, #tpu.memory_space<vmem>>, %arg3: memref<1x2x320xf32, #tpu.memory_space<vmem>>) attributes {dimension_semantics = [#tpu.dimension_semantics<parallel>], iteration_bounds = array<i64: 1>, scalar_prefetch = 0 : i64, scratch_operands = 0 : i64, tpu.core_type = #tpu.core_type<tc>, window_params = [{transform_indices = @transform_0, window_bounds = array<i64: 1, 2, 441>}, {pipeline_mode = #tpu.pipeline_mode<synchronous>, transform_indices = @transform_1, window_bounds = array<i64: 441, 320>}, {transform_indices = @transform_2, window_bounds = array<i64: 1, 2, 320>}]} {
    %c0 = arith.constant 0 : index
    %c0_0 = arith.constant 0 : index
    %c0_1 = arith.constant 0 : index
    %0 = vector.load %arg1[%c0, %c0_0, %c0_1] : memref<1x2x441xf32, #tpu.memory_space<vmem>>, vector<1x2x441xf32>
    %1 = vector.shape_cast %0 : vector<1x2x441xf32> to vector<2x441xf32>
    %c0_2 = arith.constant 0 : index
    %c0_3 = arith.constant 0 : index
    %2 = vector.load %arg2[%c0_2, %c0_3] : memref<441x320xf32, #tpu.memory_space<vmem>>, vector<441x320xf32>
    %cst = arith.constant dense<0.000000e+00> : vector<2x320xf32>
    %3 = tpu.matmul %1, %2, %cst {dimension_numbers = #tpu.dot_dimension_numbers<[1], [0], [0], [1], [0, 0, 1, 1], [], []>} : vector<2x441xf32>, vector<441x320xf32>, vector<2x320xf32> -> vector<2x320xf32>
    %c0_4 = arith.constant 0 : index
    %c0_5 = arith.constant 0 : index
    %c0_6 = arith.constant 0 : index
    %4 = vector.load %arg3[%c0_4, %c0_5, %c0_6] : memref<1x2x320xf32, #tpu.memory_space<vmem>>, vector<1x2x320xf32>
    %5 = vector.shape_cast %4 : vector<1x2x320xf32> to vector<2x320xf32>
    %6 = vector.shape_cast %3 : vector<2x320xf32> to vector<1x2x320xf32>
    tpu.vector_store %arg3[%c0_4, %c0_5, %c0_6], %6 {strides = array<i32>} : memref<1x2x320xf32, #tpu.memory_space<vmem>>, vector<1x2x320xf32>,
    return
  }
  func.func @transform_0(%arg0: i32) -> (i32, i32, i32) {
    %c0_i32 = arith.constant 0 : i32
    %c0_i32_0 = arith.constant 0 : i32
    %c0_i32_1 = arith.constant 0 : i32
    return %arg0, %c0_i32, %c0_i32_0 : i32, i32, i32
  }
  func.func @transform_1(%arg0: i32) -> (i32, i32) {
    %c0_i32 = arith.constant 0 : i32
    %c0_i32_0 = arith.constant 0 : i32
    %c0_i32_1 = arith.constant 0 : i32
    return %c0_i32, %c0_i32_0 : i32, i32
  }
  func.func @transform_2(%arg0: i32) -> (i32, i32, i32) {
    %c0_i32 = arith.constant 0 : i32
    %c0_i32_0 = arith.constant 0 : i32
    %c0_i32_1 = arith.constant 0 : i32
    return %arg0, %c0_i32, %c0_i32_0 : i32, i32, i32
  }
}

</mosaic_0001>

<bundles_post_ra>
// kernel: tpu_custom_call.1
= control target key start
LH: loop header
LB: loop body
LE: loop exit
PB: predicated region body
PF: predicated region fallthrough
CT: control target
= control target key end

     0   :  { %v791_v50 = vmov 1983009808   ;;  %v186_v52 = vlaneseq  ;;  %vm202_vm0 = vcmask 465920   ;;  %s1375_s0 = inlined_call_operand.vmem [shape: f32[1,2,441], index: 0, kind: input, shape index: {}]   ;;  %s1376_s1 = inlined_call_operand.vmem [shape: f32[441,320], index: 1, kind: input, shape index: {}]   ;;  %s1377_s2 = inlined_call_operand.hbm [shape: f32[1,2,320], index: 2, kind: output, shape index: {}]  }
   0x1   :  { %v14_v0 = vld [vmem:[%s1376_s1 + $0x8] sm:$0xff]  ;;  %v17_v1 = vld [vmem:[%s1376_s1 + $0x20] sm:$0xff]  ;;  %v63_v2 = vld [vmem:[%s1376_s1 + $0x190] sm:$0xff]  ;;  %v184_v51 = vunpack.c.l.s4 %v791_v50 }
   0x2   :  { %v577_v3 = vpack.c.bf16 %v17_v1, %v14_v0  ;;  %v66_v4 = vld [vmem:[%s1376_s1 + $0x1a8] sm:$0xff]  ;;  %v13_v5 = vld [vmem:[%s1376_s1] sm:$0xff]  ;;  %v16_v6 = vld [vmem:[%s1376_s1 + $0x18] sm:$0xff] }
   0x3   :  { %v691_v7 = vpack.c.bf16 %v66_v4, %v63_v2  ;;  %v579_v8 = vpack.c.bf16 %v16_v6, %v13_v5  ;;  %v15_v9 = vld [vmem:[%s1376_s1 + $0x10] sm:$0xff]  ;;  %v18_v10 = vld [vmem:[%s1376_s1 + $0x28] sm:$0xff]  ;;  %v20_v11 = vld [vmem:[%s1376_s1 + $0x38] sm:$0xff]  ;;  %v185_v1 = vunpack.c.0.s8 %v184_v51  ;;  %v187_v2 = vshrl.u32 %v186_v52, 7 }
   0x4   :  { %578 = vmatprep.subr.bf16.mxu0 %v577_v3  ;;  %v693_v12 = vpack.c.bf16 %v18_v10, %v15_v9  ;;  %v23_v13 = vld [vmem:[%s1376_s1 + $0x50] sm:$0xff]  ;;  %v69_v14 = vld [vmem:[%s1376_s1 + $0x1c0] sm:$0xff]  ;;  %v72_v15 = vld [vmem:[%s1376_s1 + $0x1d8] sm:$0xff] }
   0x5   :  { %692 = vmatprep.subr.bf16.mxu1 %v691_v7  ;;  %580 = vmatpush1.bf16.msra.mxu0 %v579_v8  ;;  %v581_v16 = vpack.c.bf16 %v23_v13, %v20_v11  ;;  %v695_v17 = vpack.c.bf16 %v72_v15, %v69_v14  ;;  %v19_v18 = vld [vmem:[%s1376_s1 + $0x30] sm:$0xff]  ;;  %v22_v19 = vld [vmem:[%s1376_s1 + $0x48] sm:$0xff]  ;;  %v21_v20 = vld [vmem:[%s1376_s1 + $0x40] sm:$0xff]  ;;  %v966_v15 = vsub.s32 %v185_v1, %v187_v2 }
   0x6   :  { %694 = vmatpush3.bf16.msra.mxu1 %v693_v12  ;;  %v583_v21 = vpack.c.bf16 %v22_v19, %v19_v18  ;;  %v24_v22 = vld [vmem:[%s1376_s1 + $0x58] sm:$0xff]  ;;  %v26_v23 = vld [vmem:[%s1376_s1 + $0x68] sm:$0xff]  ;;  %v29_v24 = vld [vmem:[%s1376_s1 + $0x80] sm:$0xff] }
   0x7   :  { %582 = vmatprep.subr.bf16.mxu0 %v581_v16  ;;  %696 = vmatprep.subr.bf16.mxu1 %v695_v17  ;;  %v697_v25 = vpack.c.bf16 %v24_v22, %v21_v20  ;;  %v585_v26 = vpack.c.bf16 %v29_v24, %v26_v23  ;;  %v75_v27 = vld [vmem:[%s1376_s1 + $0x1f0] sm:$0xff]  ;;  %v78_v28 = vld [vmem:[%s1376_s1 + $0x208] sm:$0xff]  ;;  %v25_v29 = vld [vmem:[%s1376_s1 + $0x60] sm:$0xff] }
   0x8   :  { %v699_v30 = vpack.c.bf16 %v78_v28, %v75_v27  ;;  %v28_v31 = vld [vmem:[%s1376_s1 + $0x78] sm:$0xff]  ;;  %v27_v32 = vld [vmem:[%s1376_s1 + $0x70] sm:$0xff]  ;;  %v30_v33 = vld [vmem:[%s1376_s1 + $0x88] sm:$0xff] }
   0x9   :  { %584 = vmatpush1.bf16.msra.mxu0 %v583_v21  ;;  %v587_v34 = vpack.c.bf16 %v28_v31, %v25_v29  ;;  %v32_v35 = vld [vmem:[%s1376_s1 + $0x98] sm:$0xff]  ;;  %v35_v36 = vld [vmem:[%s1376_s1 + $0xb0] sm:$0xff]  ;;  %v81_v37 = vld [vmem:[%s1376_s1 + $0x220] sm:$0xff]  ;;  %v701_v38 = vpack.c.bf16 %v30_v33, %v27_v32 }
   0xa   :  { %698 = vmatpush3.bf16.msra.mxu1 %v697_v25  ;;  %586 = vmatprep.subr.bf16.mxu0 %v585_v26  ;;  %v589_v39 = vpack.c.bf16 %v35_v36, %v32_v35  ;;  %v84_v40 = vld [vmem:[%s1376_s1 + $0x238] sm:$0xff]  ;;  %v31_v41 = vld [vmem:[%s1376_s1 + $0x90] sm:$0xff]  ;;  %v34_v42 = vld [vmem:[%s1376_s1 + $0xa8] sm:$0xff] }
   0xb   :  { %700 = vmatprep.subr.bf16.mxu1 %v699_v30  ;;  %v703_v43 = vpack.c.bf16 %v84_v40, %v81_v37  ;;  %v33_v44 = vld [vmem:[%s1376_s1 + $0xa0] sm:$0xff]  ;;  %v36_v45 = vld [vmem:[%s1376_s1 + $0xb8] sm:$0xff]  ;;  %v38_v46 = vld [vmem:[%s1376_s1 + $0xc8] sm:$0xff]  ;;  %v591_v53 = vpack.c.bf16 %v34_v42, %v31_v41 }
   0xc   :  { %v41_v47 = vld [vmem:[%s1376_s1 + $0xe0] sm:$0xff]  ;;  %v87_v48 = vld [vmem:[%s1376_s1 + $0x250] sm:$0xff]  ;;  %v90_v49 = vld [vmem:[%s1376_s1 + $0x268] sm:$0xff]  ;;  %v705_v54 = vpack.c.bf16 %v36_v45, %v33_v44 }
   0xd   :  { %588 = vmatpush1.bf16.msra.mxu0 %v587_v34  ;;  %v593_v55 = vpack.c.bf16 %v41_v47, %v38_v46  ;;  %v37_v56 = vld [vmem:[%s1376_s1 + $0xc0] sm:$0xff]  ;;  %v40_v57 = vld [vmem:[%s1376_s1 + $0xd8] sm:$0xff]  ;;  %v39_v58 = vld [vmem:[%s1376_s1 + $0xd0] sm:$0xff]  ;;  %v707_v59 = vpack.c.bf16 %v90_v49, %v87_v48 }
   0xe   :  { %702 = vmatpush3.bf16.msra.mxu1 %v701_v38  ;;  %590 = vmatprep.subr.bf16.mxu0 %v589_v39  ;;  %v42_v60 = vld [vmem:[%s1376_s1 + $0xe8] sm:$0xff]  ;;  %v44_v61 = vld [vmem:[%s1376_s1 + $0xf8] sm:$0xff]  ;;  %v47_v62 = vld [vmem:[%s1376_s1 + $0x110] sm:$0xff]  ;;  %v595_v3 = vpack.c.bf16 %v40_v57, %v37_v56 }
   0xf   :  { %704 = vmatprep.subr.bf16.mxu1 %v703_v43  ;;  %v93_v63 = vld [vmem:[%s1376_s1 + $0x280] sm:$0xff]  ;;  %v96_v0 = vld [vmem:[%s1376_s1 + $0x298] sm:$0xff]  ;;  %v709_v4 = vpack.c.bf16 %v42_v60, %v39_v58  ;;  %v597_v5 = vpack.c.bf16 %v47_v62, %v44_v61  ;;  %v43_v6 = vld [vmem:[%s1376_s1 + $0xf0] sm:$0xff]  ;;  %v792_v58 = vmov 0.0|0.0  }
  0x10   :  { %v46_v7 = vld [vmem:[%s1376_s1 + $0x108] sm:$0xff]  ;;  %v45_v8 = vld [vmem:[%s1376_s1 + $0x100] sm:$0xff]  ;;  %v711_v9 = vpack.c.bf16 %v96_v0, %v93_v63  ;;  %v48_v10 = vld [vmem:[%s1376_s1 + $0x118] sm:$0xff] }
  0x11   :  { %592 = vmatpush1.bf16.msra.mxu0 %v591_v53  ;;  %v50_v11 = vld [vmem:[%s1376_s1 + $0x128] sm:$0xff]  ;;  %v53_v12 = vld [vmem:[%s1376_s1 + $0x140] sm:$0xff]  ;;  %v99_v13 = vld [vmem:[%s1376_s1 + $0x2b0] sm:$0xff]  ;;  %v599_v16 = vpack.c.bf16 %v46_v7, %v43_v6  ;;  %v713_v18 = vpack.c.bf16 %v48_v10, %v45_v8 }
  0x12   :  { %706 = vmatpush3.bf16.msra.mxu1 %v705_v54  ;;  %594 = vmatprep.subr.bf16.mxu0 %v593_v55  ;;  %v102_v14 = vld [vmem:[%s1376_s1 + $0x2c8] sm:$0xff]  ;;  %v49_v17 = vld [vmem:[%s1376_s1 + $0x120] sm:$0xff]  ;;  %v601_v19 = vpack.c.bf16 %v53_v12, %v50_v11  ;;  %v52_v20 = vld [vmem:[%s1376_s1 + $0x138] sm:$0xff] }
  0x13   :  { %708 = vmatprep.subr.bf16.mxu1 %v707_v59  ;;  %v51_v21 = vld [vmem:[%s1376_s1 + $0x130] sm:$0xff]  ;;  %v54_v22 = vld [vmem:[%s1376_s1 + $0x148] sm:$0xff]  ;;  %v715_v23 = vpack.c.bf16 %v102_v14, %v99_v13  ;;  %v56_v24 = vld [vmem:[%s1376_s1 + $0x158] sm:$0xff]  ;;  %v603_v30 = vpack.c.bf16 %v52_v20, %v49_v17 }
  0x14   :  { %v59_v25 = vld [vmem:[%s1376_s1 + $0x170] sm:$0xff]  ;;  %v12_v26 = vld [vmem:[%s1375_s0] sm:$0xff]  ;;  %v108_v28 = vld [vmem:[%s1376_s1 + $0x2f8] sm:$0xff]  ;;  %v717_v31 = vpack.c.bf16 %v54_v22, %v51_v21 }
  0x15   :  { %596 = vmatpush1.bf16.msra.mxu0 %v595_v3  ;;  %v105_v27 = vld [vmem:[%s1376_s1 + $0x2e0] sm:$0xff]  ;;  %v996_v29 = vrot.slane %v12_v26, %v966_v15  ;;  %v605_v32 = vpack.c.bf16 %v59_v25, %v56_v24  ;;  %v55_v33 = vld [vmem:[%s1376_s1 + $0x150] sm:$0xff]  ;;  %v58_v34 = vld [vmem:[%s1376_s1 + $0x168] sm:$0xff]  ;;  %v182_v41 = vcombine.high %v12_v26, %v12_v26 }
  0x16   :  { %710 = vmatpush3.bf16.msra.mxu1 %v709_v4  ;;  %598 = vmatprep.subr.bf16.mxu0 %v597_v5  ;;  %v57_v35 = vld [vmem:[%s1376_s1 + $0x160] sm:$0xff]  ;;  %v719_v37 = vpack.c.bf16 %v108_v28, %v105_v27  ;;  %v60_v38 = vld [vmem:[%s1376_s1 + $0x178] sm:$0xff]  ;;  %v62_v39 = vld [vmem:[%s1376_s1 + $0x188] sm:$0xff]  ;;  %v607_v42 = vpack.c.bf16 %v58_v34, %v55_v33 }
  0x17   :  { %712 = vmatprep.subr.bf16.mxu1 %v711_v9  ;;  %v197_v36 = vcombine.high %v996_v29, %v996_v29  ;;  %v65_v40 = vld [vmem:[%s1376_s1 + $0x1a0] sm:$0xff]  ;;  %v721_v43 = vpack.c.bf16 %v60_v38, %v57_v35  ;;  %v64_v46 = vld [vmem:[%s1376_s1 + $0x198] sm:$0xff]  ;;  %v111_v47 = vld [vmem:[%s1376_s1 + $0x310] sm:$0xff]  ;;  %v1028_v48 = vrot.slane %v182_v41, %v966_v15 }
  0x18   :  { %v609_v44 = vpack.c.bf16 %v65_v40, %v62_v39  ;;  %v61_v45 = vld [vmem:[%s1376_s1 + $0x180] sm:$0xff]  ;;  %v114_v49 = vld [vmem:[%s1376_s1 + $0x328] sm:$0xff]  ;;  %v68_v50 = vld [vmem:[%s1376_s1 + $0x1b8] sm:$0xff] }
  0x19   :  { %600 = vmatpush1.bf16.msra.mxu0 %v599_v16  ;;  %421 = vmatprep.mubr.f32.mxu1 %v197_v36  ;;  %v71_v51 = vld [vmem:[%s1376_s1 + $0x1d0] sm:$0xff]  ;;  %v611_v52 = vpack.c.bf16 %v64_v46, %v61_v45  ;;  %v724_v53 = vpack.c.bf16 %v114_v49, %v111_v47  ;;  %v70_v56 = vld [vmem:[%s1376_s1 + $0x1c8] sm:$0xff]  ;;  %v117_v57 = vld [vmem:[%s1376_s1 + $0x340] sm:$0xff]  ;;  %v1060_v62 = vcombine.high %v1028_v48, %v1028_v48 }
  0x1a   :  { %714 = vmatpush3.bf16.msra.mxu1 %v713_v18  ;;  %602 = vmatprep.subr.bf16.mxu0 %v601_v19  ;;  %v613_v54 = vpack.c.bf16 %v71_v51, %v68_v50  ;;  %v67_v55 = vld [vmem:[%s1376_s1 + $0x1b0] sm:$0xff]  ;;  %v120_v59 = vld [vmem:[%s1376_s1 + $0x358] sm:$0xff]  ;;  %v74_v60 = vld [vmem:[%s1376_s1 + $0x1e8] sm:$0xff] }
  0x1b   :  { %716 = vmatprep.subr.bf16.mxu1 %v715_v23  ;;  %279 = vmatprep.mubr.f32.mxu0 %v197_v36  ;;  %v77_v61 = vld [vmem:[%s1376_s1 + $0x200] sm:$0xff]  ;;  %v615_v63 = vpack.c.bf16 %v70_v56, %v67_v55  ;;  %v727_v0 = vpack.c.bf16 %v120_v59, %v117_v57  ;;  %v76_v3 = vld [vmem:[%s1376_s1 + $0x1f8] sm:$0xff]  ;;  %v123_v4 = vld [vmem:[%s1376_s1 + $0x370] sm:$0xff] }
  0x1c   :  { %v617_v1 = vpack.c.bf16 %v77_v61, %v74_v60  ;;  %v73_v2 = vld [vmem:[%s1376_s1 + $0x1e0] sm:$0xff]  ;;  %v126_v5 = vld [vmem:[%s1376_s1 + $0x388] sm:$0xff]  ;;  %v80_v6 = vld [vmem:[%s1376_s1 + $0x218] sm:$0xff] }
  0x1d   :  { %604 = vmatpush1.bf16.msra.mxu0 %v603_v30  ;;  %v83_v7 = vld [vmem:[%s1376_s1 + $0x230] sm:$0xff]  ;;  %v619_v8 = vpack.c.bf16 %v76_v3, %v73_v2  ;;  %v730_v9 = vpack.c.bf16 %v126_v5, %v123_v4  ;;  %v82_v12 = vld [vmem:[%s1376_s1 + $0x228] sm:$0xff]  ;;  %v129_v13 = vld [vmem:[%s1376_s1 + $0x3a0] sm:$0xff] }
  0x1e   :  { %718 = vmatpush3.bf16.msra.mxu1 %v717_v31  ;;  %606 = vmatprep.subr.bf16.mxu0 %v605_v32  ;;  %v621_v10 = vpack.c.bf16 %v83_v7, %v80_v6  ;;  %v79_v11 = vld [vmem:[%s1376_s1 + $0x210] sm:$0xff]  ;;  %v132_v14 = vld [vmem:[%s1376_s1 + $0x3b8] sm:$0xff]  ;;  %v86_v16 = vld [vmem:[%s1376_s1 + $0x248] sm:$0xff] }
  0x1f   :  { %720 = vmatprep.subr.bf16.mxu1 %v719_v37  ;;  %v89_v17 = vld [vmem:[%s1376_s1 + $0x260] sm:$0xff]  ;;  %v623_v18 = vpack.c.bf16 %v82_v12, %v79_v11  ;;  %v733_v19 = vpack.c.bf16 %v132_v14, %v129_v13  ;;  %v88_v22 = vld [vmem:[%s1376_s1 + $0x258] sm:$0xff]  ;;  %v135_v23 = vld [vmem:[%s1376_s1 + $0x3d0] sm:$0xff] }
  0x20   :  { %v625_v20 = vpack.c.bf16 %v89_v17, %v86_v16  ;;  %v85_v21 = vld [vmem:[%s1376_s1 + $0x240] sm:$0xff]  ;;  %v138_v24 = vld [vmem:[%s1376_s1 + $0x3e8] sm:$0xff]  ;;  %v92_v25 = vld [vmem:[%s1376_s1 + $0x278] sm:$0xff] }
  0x21   :  { %608 = vmatpush1.bf16.msra.mxu0 %v607_v42  ;;  %v95_v26 = vld [vmem:[%s1376_s1 + $0x290] sm:$0xff]  ;;  %v627_v27 = vpack.c.bf16 %v88_v22, %v85_v21  ;;  %v736_v28 = vpack.c.bf16 %v138_v24, %v135_v23  ;;  %v94_v32 = vld [vmem:[%s1376_s1 + $0x288] sm:$0xff]  ;;  %v141_v33 = vld [vmem:[%s1376_s1 + $0x400] sm:$0xff] }
  0x22   :  { %722 = vmatpush3.bf16.msra.mxu1 %v721_v43  ;;  %610 = vmatprep.subr.bf16.mxu0 %v609_v44  ;;  %v629_v30 = vpack.c.bf16 %v95_v26, %v92_v25  ;;  %v91_v31 = vld [vmem:[%s1376_s1 + $0x270] sm:$0xff]  ;;  %v144_v34 = vld [vmem:[%s1376_s1 + $0x418] sm:$0xff]  ;;  %v98_v35 = vld [vmem:[%s1376_s1 + $0x2a8] sm:$0xff] }
  0x23   :  { %723 = vmatprep.subr.bf16.mxu1 %v792_v58  ;;  %v101_v36 = vld [vmem:[%s1376_s1 + $0x2c0] sm:$0xff]  ;;  %v631_v37 = vpack.c.bf16 %v94_v32, %v91_v31  ;;  %v739_v38 = vpack.c.bf16 %v144_v34, %v141_v33  ;;  %v100_v41 = vld [vmem:[%s1376_s1 + $0x2b8] sm:$0xff]  ;;  %v147_v42 = vld [vmem:[%s1376_s1 + $0x430] sm:$0xff] }
  0x24   :  { %v633_v39 = vpack.c.bf16 %v101_v36, %v98_v35  ;;  %v97_v40 = vld [vmem:[%s1376_s1 + $0x2a0] sm:$0xff]  ;;  %v150_v43 = vld [vmem:[%s1376_s1 + $0x448] sm:$0xff]  ;;  %v104_v44 = vld [vmem:[%s1376_s1 + $0x2d8] sm:$0xff] }
  0x25   :  { %612 = vmatpush1.bf16.msra.mxu0 %v611_v52  ;;  %422 = vmatmul.mubr.f32.vlgmr.msra.gmra.mrb[0].mxu1 %v996_v29  ;;  %v107_v45 = vld [vmem:[%s1376_s1 + $0x2f0] sm:$0xff]  ;;  %v635_v46 = vpack.c.bf16 %v100_v41, %v97_v40 }
  0x26   :  { %725 = vmatpush1.bf16.msra.mxu1 %v724_v53  ;;  %614 = vmatprep.subr.bf16.mxu0 %v613_v54 }
  0x27   :  { %726 = vmatprep.subr.bf16.mxu1 %v792_v58  ;;  %541 = vmatprep.mubr.msk.f32.mxu1 %vm202_vm0, %v1060_v62 }
  0x29   :  { %616 = vmatpush1.bf16.msra.mxu0 %v615_v63 }
  0x2a   :  { %728 = vmatpush1.bf16.msra.mxu1 %v727_v0  ;;  %618 = vmatprep.subr.bf16.mxu0 %v617_v1 }
  0x2b   :  { %729 = vmatprep.subr.bf16.mxu1 %v792_v58 }
  0x2d   :  { %620 = vmatpush1.bf16.msra.mxu0 %v619_v8 }
  0x2e   :  { %731 = vmatpush1.bf16.msra.mxu1 %v730_v9  ;;  %622 = vmatprep.subr.bf16.mxu0 %v621_v10 }
  0x2f   :  { %732 = vmatprep.subr.bf16.mxu1 %v792_v58 }
  0x31   :  { %624 = vmatpush1.bf16.msra.mxu0 %v623_v18 }
  0x32   :  { %734 = vmatpush1.bf16.msra.mxu1 %v733_v19  ;;  %626 = vmatprep.subr.bf16.mxu0 %v625_v20 }
  0x33   :  { %735 = vmatprep.subr.bf16.mxu1 %v792_v58 }
  0x35   :  { %628 = vmatpush1.bf16.msra.mxu0 %v627_v27 }
  0x36   :  { %737 = vmatpush1.bf16.msra.mxu1 %v736_v28  ;;  %630 = vmatprep.subr.bf16.mxu0 %v629_v30 }
  0x37   :  { %738 = vmatprep.subr.bf16.mxu1 %v792_v58 }
  0x39   :  { %632 = vmatpush1.bf16.msra.mxu0 %v631_v37 }
  0x3a   :  { %7 = vsyncpa [#allocation3], 0  ;;  %740 = vmatpush1.bf16.msra.mxu1 %v739_v38  ;;  %634 = vmatprep.subr.bf16.mxu0 %v633_v39  ;;  %v742_v47 = vpack.c.bf16 %v150_v43, %v147_v42  ;;  %v637_v49 = vpack.c.bf16 %v107_v45, %v104_v44  ;;  %v103_v50 = vld [vmem:[%s1376_s1 + $0x2d0] sm:$0xff]  ;;  %v106_v51 = vld [vmem:[%s1376_s1 + $0x2e8] sm:$0xff]  ;;  %vm205_vm1 = vcmask 1040384   ;;  %vm793_vm2 = vmmov 1  }
  0x3b   :  { %v153_v52 = vld [vmem:[%s1376_s1 + $0x460] sm:$0xff]  ;;  %741 = vmatprep.subr.bf16.mxu1 %v792_v58  ;;  %v156_v53 = vld [vmem:[%s1376_s1 + $0x478] sm:$0xff]  ;;  %v110_v54 = vld [vmem:[%s1376_s1 + $0x308] sm:$0xff]  ;;  %v639_v56 = vpack.c.bf16 %v106_v51, %v103_v50  ;;  %vm517_vm4 = vcmask 1041408   ;;  %vm518_vm5 = vcmask 1043458   ;;  %vm520_vm7 = vcmask 521220  }
  0x3c   :  { %v113_v55 = vld [vmem:[%s1376_s1 + $0x320] sm:$0xff]  ;;  %v745_v57 = vpack.c.bf16 %v156_v53, %v153_v52  ;;  %v112_v61 = vld [vmem:[%s1376_s1 + $0x318] sm:$0xff]  ;;  %v159_v63 = vld [vmem:[%s1376_s1 + $0x490] sm:$0xff] }
  0x3d   :  { %636 = vmatpush1.bf16.msra.mxu0 %v635_v46  ;;  %v641_v59 = vpack.c.bf16 %v113_v55, %v110_v54  ;;  %v109_v60 = vld [vmem:[%s1376_s1 + $0x300] sm:$0xff]  ;;  %v162_v0 = vld [vmem:[%s1376_s1 + $0x4a8] sm:$0xff]  ;;  %v116_v1 = vld [vmem:[%s1376_s1 + $0x338] sm:$0xff] }
  0x3e   :  { %743 = vmatpush1.bf16.msra.mxu1 %v742_v47  ;;  %638 = vmatprep.subr.bf16.mxu0 %v637_v49  ;;  %v119_v2 = vld [vmem:[%s1376_s1 + $0x350] sm:$0xff]  ;;  %v643_v3 = vpack.c.bf16 %v112_v61, %v109_v60  ;;  %v748_v4 = vpack.c.bf16 %v162_v0, %v159_v63  ;;  %v118_v7 = vld [vmem:[%s1376_s1 + $0x348] sm:$0xff]  ;;  %v165_v8 = vld [vmem:[%s1376_s1 + $0x4c0] sm:$0xff] }
  0x3f   :  { %744 = vmatprep.subr.bf16.mxu1 %v792_v58  ;;  %v645_v5 = vpack.c.bf16 %v119_v2, %v116_v1  ;;  %v115_v6 = vld [vmem:[%s1376_s1 + $0x330] sm:$0xff]  ;;  %v168_v9 = vld [vmem:[%s1376_s1 + $0x4d8] sm:$0xff]  ;;  %v122_v10 = vld [vmem:[%s1376_s1 + $0x368] sm:$0xff] }
  0x40   :  { %v125_v11 = vld [vmem:[%s1376_s1 + $0x380] sm:$0xff]  ;;  %v647_v12 = vpack.c.bf16 %v118_v7, %v115_v6  ;;  %v751_v13 = vpack.c.bf16 %v168_v9, %v165_v8  ;;  %v124_v17 = vld [vmem:[%s1376_s1 + $0x378] sm:$0xff]  ;;  %v131_v19 = vld [vmem:[%s1376_s1 + $0x3b0] sm:$0xff] }
  0x41   :  { %640 = vmatpush1.bf16.msra.mxu0 %v639_v56  ;;  %v649_v14 = vpack.c.bf16 %v125_v11, %v122_v10  ;;  %v121_v16 = vld [vmem:[%s1376_s1 + $0x360] sm:$0xff]  ;;  %v128_v18 = vld [vmem:[%s1376_s1 + $0x398] sm:$0xff]  ;;  %v127_v23 = vld [vmem:[%s1376_s1 + $0x390] sm:$0xff] }
  0x42   :  { %746 = vmatpush1.bf16.msra.mxu1 %v745_v57  ;;  %642 = vmatprep.subr.bf16.mxu0 %v641_v59  ;;  %v651_v20 = vpack.c.bf16 %v124_v17, %v121_v16  ;;  %v653_v22 = vpack.c.bf16 %v131_v19, %v128_v18  ;;  %v130_v24 = vld [vmem:[%s1376_s1 + $0x3a8] sm:$0xff]  ;;  %v177_v25 = vld [vmem:[%s1376_s1 + $0x520] sm:$0xff]  ;;  %v180_v26 = vld [vmem:[%s1376_s1 + $0x538] sm:$0x1] }
  0x43   :  { %747 = vmatprep.subr.bf16.mxu1 %v792_v58  ;;  %v134_v27 = vld [vmem:[%s1376_s1 + $0x3c8] sm:$0xff]  ;;  %v137_v28 = vld [vmem:[%s1376_s1 + $0x3e0] sm:$0xff]  ;;  %v655_v30 = vpack.c.bf16 %v130_v24, %v127_v23  ;;  %v757_v31 = vpack.c.bf16 %v180_v26, %v177_v25  ;;  %v136_v34 = vld [vmem:[%s1376_s1 + $0x3d8] sm:$0xff] }
  0x44   :  { %280 = vmatmul.mubr.f32.vlgmr.msra.gmra.mrb[0].mxu0 %v996_v29  ;;  %v171_v29 = vld [vmem:[%s1376_s1 + $0x4f0] sm:$0xff]  ;;  %v657_v32 = vpack.c.bf16 %v137_v28, %v134_v27  ;;  %v133_v33 = vld [vmem:[%s1376_s1 + $0x3c0] sm:$0xff]  ;;  %vm1265_vm3 = vmpackc.low %vm205_vm1, %vm793_vm2 }
  0x45   :  { %644 = vmatpush1.bf16.msra.mxu0 %v643_v3  ;;  %539 = vmatprep.mubr.msk.f32.mxu0 %vm202_vm0, %v1060_v62  ;;  %v174_v62 = vld [vmem:[%s1376_s1 + $0x508] sm:$0xff]  ;;  %v140_v36 = vld [vmem:[%s1376_s1 + $0x3f8] sm:$0xff]  ;;  %v143_v37 = vld [vmem:[%s1376_s1 + $0x410] sm:$0xff]  ;;  %v659_v38 = vpack.c.bf16 %v136_v34, %v133_v33 }
  0x46   :  { %749 = vmatpush1.bf16.msra.mxu1 %v748_v4  ;;  %646 = vmatprep.subr.bf16.mxu0 %v645_v5  ;;  %v754_v21 = vpack.c.bf16 %v174_v62, %v171_v29  ;;  %v139_v39 = vld [vmem:[%s1376_s1 + $0x3f0] sm:$0xff]  ;;  %v142_v40 = vld [vmem:[%s1376_s1 + $0x408] sm:$0xff]  ;;  %v149_v42 = vld [vmem:[%s1376_s1 + $0x440] sm:$0xff] }
  0x47   :  { %750 = vmatprep.subr.bf16.mxu1 %v792_v58  ;;  %v146_v41 = vld [vmem:[%s1376_s1 + $0x428] sm:$0xff]  ;;  %v663_v43 = vpack.c.bf16 %v142_v40, %v139_v39  ;;  %v145_v45 = vld [vmem:[%s1376_s1 + $0x420] sm:$0xff]  ;;  %v148_v46 = vld [vmem:[%s1376_s1 + $0x438] sm:$0xff] }
  0x48   :  { %v665_v44 = vpack.c.bf16 %v149_v42, %v146_v41  ;;  %v152_v47 = vld [vmem:[%s1376_s1 + $0x458] sm:$0xff]  ;;  %v155_v49 = vld [vmem:[%s1376_s1 + $0x470] sm:$0xff]  ;;  %v667_v50 = vpack.c.bf16 %v148_v46, %v145_v45  ;;  %v154_v53 = vld [vmem:[%s1376_s1 + $0x468] sm:$0xff] }
  0x49   :  { %648 = vmatpush1.bf16.msra.mxu0 %v647_v12  ;;  %v669_v51 = vpack.c.bf16 %v155_v49, %v152_v47  ;;  %v151_v52 = vld [vmem:[%s1376_s1 + $0x450] sm:$0xff]  ;;  %v158_v54 = vld [vmem:[%s1376_s1 + $0x488] sm:$0xff]  ;;  %v161_v55 = vld [vmem:[%s1376_s1 + $0x4a0] sm:$0xff] }
  0x4a   :  { %752 = vmatpush1.bf16.msra.mxu1 %v751_v13  ;;  %650 = vmatprep.subr.bf16.mxu0 %v649_v14  ;;  %v671_v56 = vpack.c.bf16 %v154_v53, %v151_v52  ;;  %v673_v57 = vpack.c.bf16 %v161_v55, %v158_v54  ;;  %v157_v59 = vld [vmem:[%s1376_s1 + $0x480] sm:$0xff]  ;;  %v160_v60 = vld [vmem:[%s1376_s1 + $0x498] sm:$0xff]  ;;  %v167_v63 = vld [vmem:[%s1376_s1 + $0x4d0] sm:$0xff] }
  0x4b   :  { %753 = vmatprep.subr.bf16.mxu1 %v792_v58  ;;  %v164_v61 = vld [vmem:[%s1376_s1 + $0x4b8] sm:$0xff]  ;;  %v675_v0 = vpack.c.bf16 %v160_v60, %v157_v59  ;;  %v163_v2 = vld [vmem:[%s1376_s1 + $0x4b0] sm:$0xff]  ;;  %v166_v3 = vld [vmem:[%s1376_s1 + $0x4c8] sm:$0xff] }
  0x4c   :  { %v677_v1 = vpack.c.bf16 %v167_v63, %v164_v61  ;;  %v170_v4 = vld [vmem:[%s1376_s1 + $0x4e8] sm:$0xff]  ;;  %v173_v5 = vld [vmem:[%s1376_s1 + $0x500] sm:$0xff]  ;;  %v679_v6 = vpack.c.bf16 %v166_v3, %v163_v2  ;;  %v172_v9 = vld [vmem:[%s1376_s1 + $0x4f8] sm:$0xff] }
  0x4d   :  { %652 = vmatpush1.bf16.msra.mxu0 %v651_v20  ;;  %v681_v7 = vpack.c.bf16 %v173_v5, %v170_v4  ;;  %v169_v8 = vld [vmem:[%s1376_s1 + $0x4e0] sm:$0xff]  ;;  %v176_v10 = vld [vmem:[%s1376_s1 + $0x518] sm:$0xff]  ;;  %v179_v11 = vld [vmem:[%s1376_s1 + $0x530] sm:$0x1] }
  0x4e   :  { %755 = vmatpush1.bf16.msra.mxu1 %v754_v21  ;;  %654 = vmatprep.subr.bf16.mxu0 %v653_v22  ;;  %v683_v12 = vpack.c.bf16 %v172_v9, %v169_v8  ;;  %v685_v13 = vpack.c.bf16 %v179_v11, %v176_v10  ;;  %v175_v14 = vld [vmem:[%s1376_s1 + $0x510] sm:$0xff]  ;;  %v178_v16 = vld [vmem:[%s1376_s1 + $0x528] sm:$0x1]  ;;  %vm519_vm6 = vmor %vm518_vm5, %vm517_vm4  ;;  %s794_s1 = smov [#allocation2]  }
  0x4f   :  { %756 = vmatprep.subr.bf16.mxu1 %v792_v58  ;;  %v661_v58 = vpack.c.bf16 %v143_v37, %v140_v36  ;;  %v688_v17 = vpack.c.bf16 %v178_v16, %v175_v14  ;;  %s529_s3 = sshll.u32 %s794_s1, 4  ;;  %vm521_vm8 = vmor %vm520_vm7, %vm519_vm6  ;;  %s530_s3 = int_to_ptr.vmem [resolvable:$true] %s529_s3 }
  0x50   :  { %s767_s4 = scalar_lea.vmem %s530_s3, 96  ;;  %p772_p1 = scmp.lt.s32.totalorder %s530_s3, %s530_s3 }
  0x51   :  { %656 = vmatpush1.bf16.msra.mxu0 %v655_v30  ;;  %p768_p0 = scmp.ne.s32.totalorder %s530_s3, %s767_s4  ;;  %p773_p2 = scmp.lt.s32.totalorder %s767_s4, %s767_s4 }
  0x52   :  { %759 = vmatpush1.bf16.msk.msra.mxu1 %vm1265_vm3, %v757_v31  ;;  %658 = vmatprep.subr.bf16.mxu0 %v657_v32 }
  0x53   :  { %p774_p3 = por %p773_p2, %p772_p1 }
  0x55   :  { %492 = vmatmul.mubr.f32.vlgmr.msra.gmra.mrb[2].mxu1 %v1028_v48  ;;  %660 = vmatpush1.bf16.msra.mxu0 %v659_v38  ;;  %p775_p4 = pnand %p774_p3, %p768_p0 }
  0x56   :  { %662 = vmatprep.subr.bf16.mxu0 %v661_v58 }
  0x59   :  { %664 = vmatpush1.bf16.msra.mxu0 %v663_v43 }
  0x5a   :  { %666 = vmatprep.subr.bf16.mxu0 %v665_v44 }
  0x5d   :  { %668 = vmatpush1.bf16.msra.mxu0 %v667_v50 }
  0x5e   :  { %670 = vmatprep.subr.bf16.mxu0 %v669_v51 }
  0x61   :  { %672 = vmatpush1.bf16.msra.mxu0 %v671_v56 }
  0x62   :  { %674 = vmatprep.subr.bf16.mxu0 %v673_v57 }
  0x65   :  { %676 = vmatpush1.bf16.msra.mxu0 %v675_v0 }
  0x66   :  { %678 = vmatprep.subr.bf16.mxu0 %v677_v1 }
  0x69   :  { %680 = vmatpush1.bf16.msra.mxu0 %v679_v6 }
  0x6a   :  { %682 = vmatprep.subr.bf16.mxu0 %v681_v7 }
  0x6d   :  { %684 = vmatpush1.bf16.msra.mxu0 %v683_v12 }
  0x6e   :  { %687 = vmatprep.subr.msk.bf16.mxu0 %vm1265_vm3, %v685_v13 }
  0x71   :  { %690 = vmatpush1.bf16.msk.msra.mxu0 %vm1265_vm3, %v688_v17 }
  0x74   :  { %351 = vmatmul.mubr.f32.vlgmr.msra.gmra.mrb[0].mxu0 %v1028_v48 }
  0xf8   :  { %v574_v29 = vpop.f32.mrb[0].mxu1 }
  0xf9   :  { %v575_v62 = vpop.f32.mrb[1].mxu1 }
  0xfa   :  { %v576_v18 = vadd.f32 %v575_v62, %v574_v29 }
 0x128   :  { %v493_v19 = vpop.f32.mrb[2].mxu1 }
 0x129   :  { %v494_v20 = vadd.f32 %v576_v18, %v493_v19  ;;  %v495_v21 = vpop.f32.mrb[3].mxu1 }
 0x12b   :  { %v514_v25 = vrot.slane %v494_v20, %v966_v15 }
 0x147   :  { %v352_v22 = vpop.f32.mrb[0].mxu0 }
 0x148   :  { %v354_v23 = vpop.f32.mrb[1].mxu0 }
 0x149   :  { %v500_v24 = vcombine.low %v352_v22, %v354_v23 }
 0x14b   :  { %v507_v26 = vrot.slane %v500_v24, %v966_v15 }
 0x14d   :  { %v515_v48 = vcombine.low %v507_v26, %v514_v25 }
 0x14f   :  { %522 = vst.msk [vmem:[#allocation2] sm:$0x3f] %vm521_vm8, %v515_v48 }
 0x150   :  { %778 = shalt.err (!%p775_p4)
}
 0x151   :  { %s779_s7 = scalar_lea.hbm %s1377_s2, 96 }
 0x152   :  { %p780_p5 = scmp.ne.s32.totalorder %s1377_s2, %s779_s7  ;;  %p783_p6 = scmp.lt.u32.totalorder %s779_s7, %s1377_s2 }
 0x154   :  { %p785_p7 = pnand %p783_p6, %p780_p5 }
 0x156   :  { %788 = shalt.err (!%p785_p7)
}
 0x157   :  { %532 = dma.vmem_to_hbm [thread:$0]  %s530_s3, 96, %s1377_s2, [#allocation3]  }
 0x158   :  { %789 = dma.done.wait [#allocation3], 96  }
 0x159   :  { %790 = vsyncadd [#allocation3], 4294967200 }
 0x15a   :  { %536 = vsyncpa [#allocation3], 1 }

</bundles_post_ra>
